<compile_context>
chip_gen: v6e
topology: v6e:2x2x1
jax: 0.10.0
libtpu: 0.0.40
codegen_flags: <defaults>
</compile_context>

<pallas_src>
import functools
import math
from dataclasses import dataclass

import jax
import jax.numpy as jnp
from jax.experimental import pallas as pl
from jax.experimental.pallas import tpu as pltpu


# ----------------------------------------------------------------------------
# small helpers
# ----------------------------------------------------------------------------
def _round_up(x, m):
    return (x + m - 1) // m * m


@functools.lru_cache(maxsize=None)
def _vmem_limit_bytes():
    """Per-generation scoped VMEM limit: v7x has 64 MiB/TC, v5e/v6e 128 MiB."""
    try:
        kind = jax.devices()[0].device_kind.lower()
    except Exception:  # pragma: no cover - be conservative if query fails
        kind = ""
    is_v7 = "7" in kind
    return (32 if is_v7 else 48) * 1024 * 1024


_BM_MAX = 8192                      # max (unfolded) patch rows per grid step
_BM_TARGET_BYTES = 2 * 1024 * 1024  # target >= ~2 MiB of patch rows per step


def _choose_m_tiling(m, kp, fold, ncols, out_itemsize):
    """Pick (block_m, grid_m, padded_M); block_m is a multiple of 8*fold."""
    align = 8 * fold
    budget = int(_vmem_limit_bytes() * 0.6)

    # Resident weight + bias (assume double-buffered in the worst case).
    fixed = 2 * (fold * kp) * ncols * 2 + 2 * 4 * ncols
    # Bytes per *folded* row: bf16 patch row + output row, double-buffered.
    per_row = 2 * (fold * kp * 2) + 2 * (ncols * out_itemsize)
    rows_budget = max(8, ((max(budget - fixed, 0) // max(per_row, 1)) // 8) * 8)

    # K-aware target: amortize the ~0.35us/step pipeline overhead and fill a
    # 256-row MXU pass after folding.
    target = max(256 * fold, _round_up(max(_BM_TARGET_BYTES // (2 * kp), 1), align))
    bm = min(target, _BM_MAX, rows_budget * fold)
    bm = max(align, (bm // align) * align)
    bm = min(bm, _round_up(m, align))

    grid_m = -(-m // bm)
    # Keep the grid even so a v7x chip's two TensorCores both get work.
    if grid_m > 1 and grid_m % 2:
        grid_m += 1
    elif grid_m == 1 and m >= 2 * 256 * fold:
        grid_m = 2
    bm = _round_up(-(-m // grid_m), align)
    mp = bm * grid_m
    return bm, grid_m, mp


# ----------------------------------------------------------------------------
# kernel
# ----------------------------------------------------------------------------
def _fused_convbn_kernel(x_ref, w_ref, b_ref, o_ref, *, apply_relu):
    """x: (bm, K) bf16 patches, w: (K, N) bf16 (BN scale folded), b: (1, N) f32."""
    acc = jnp.dot(x_ref[...], w_ref[...], preferred_element_type=jnp.float32)
    y = acc + b_ref[...]
    if apply_relu:
        y = jnp.maximum(y, 0.0)
    o_ref[...] = y.astype(o_ref.dtype)


# ----------------------------------------------------------------------------
# per-layer weight preparation (hoisted out of the per-forward path)
# ----------------------------------------------------------------------------
@dataclass(frozen=True)
class PreparedLayer:
    w_call: jax.Array   # (fold*Kp, ncols) bf16, BN scale folded in
    b_call: jax.Array   # (1, ncols) f32
    cout: int
    cin: int
    k: int              # original contraction dim = 9*cin
    kp: int             # padded contraction dim
    fold: int           # kron row-fold factor (1 if none)
    ncols: int          # output columns produced by the kernel


def _prepare_layer(w_oihw, bn):
    cout, cin, kh, kw = w_oihw.shape
    k = kh * kw * cin

    inv_std = 1.0 / jnp.sqrt(bn["var"].astype(jnp.float32) + bn["eps"])
    scale = bn["gamma"].astype(jnp.float32) * inv_std                  # (cout,)
    bias = bn["beta"].astype(jnp.float32) - bn["mean"].astype(jnp.float32) * scale
    # (Cout, Cin, KH, KW) -> (KH*KW*Cin, Cout) matching the patch column order.
    w_mat = jnp.transpose(w_oihw.astype(jnp.float32), (2, 3, 1, 0)).reshape(k, cout)
    w_mat = w_mat * scale[None, :]

    # Output-column strategy (static per layer, lane-dense stores everywhere).
    r = 128 // math.gcd(cout, 128)
    if cout % 128 == 0:
        fold, ncols = 1, cout
    elif cout < 64 and r <= 16:
        fold, ncols = r, r * cout
    else:
        fold, ncols = 1, _round_up(cout, 128)

    # Pad K so fold*Kp % 128 == 0 and Kp % 16 == 0 (bf16 sublane packing).
    k_unit = max(16, 128 // fold)
    kp = _round_up(k, k_unit)
    w_pad = jnp.pad(w_mat, ((0, kp - k), (0, 0)))

    if fold > 1:
        w_call = jnp.kron(jnp.eye(fold, dtype=w_pad.dtype), w_pad)     # block-diag
        b_call = jnp.tile(bias[None, :], (1, fold))
    else:
        w_call = jnp.pad(w_pad, ((0, 0), (0, ncols - cout)))
        b_call = jnp.pad(bias[None, :], ((0, 0), (0, ncols - cout)))

    return PreparedLayer(
        w_call=jnp.asarray(w_call, jnp.bfloat16),
        b_call=jnp.asarray(b_call, jnp.float32),
        cout=cout, cin=cin, k=k, kp=kp, fold=fold, ncols=ncols)


def prepare_patch_embed_params(params):
    """Fold BN into the conv weights and build kernel-ready matrices once."""
    return [_prepare_layer(w, bn) for (w, bn) in params]


# ----------------------------------------------------------------------------
# forward
# ----------------------------------------------------------------------------
def _im2col(x_nhwc, ks=3, stride=2, pad=1):
    """Extract conv patches (column order kh, kw, cin) in bf16."""
    B, H, W, C = x_nhwc.shape
    xp = jnp.pad(x_nhwc, ((0, 0), (pad, pad), (pad, pad), (0, 0)))
    Ho = (H + 2 * pad - ks) // stride + 1
    Wo = (W + 2 * pad - ks) // stride + 1
    cols = []
    for kh in range(ks):
        for kw in range(ks):
            cols.append(xp[:, kh:kh + stride * Ho:stride,
                           kw:kw + stride * Wo:stride, :])
    patches = jnp.concatenate(cols, axis=-1)              # (B, Ho, Wo, ks*ks*C)
    return patches.reshape(B * Ho * Wo, ks * ks * C), (B, Ho, Wo)


def conv2d_bn_act(x_nhwc, layer: PreparedLayer, *, apply_relu, out_dtype):
    """One Conv2dBN(+ReLU) block: 3x3 stride-2 pad-1 conv + BN(eval) (+ReLU)."""
    patches, (b, ho, wo) = _im2col(x_nhwc.astype(jnp.bfloat16))
    m, k = patches.shape
    assert k == layer.k, (k, layer.k)

    kp, fold, ncols, cout = layer.kp, layer.fold, layer.ncols, layer.cout
    if kp != k:
        patches = jnp.pad(patches, ((0, 0), (0, kp - k)))

    bm, grid_m, mp = _choose_m_tiling(m, kp, fold, ncols,
                                      jnp.dtype(out_dtype).itemsize)
    if mp != m:
        patches = jnp.pad(patches, ((0, mp - m), (0, 0)))
    if fold > 1:
        patches = patches.reshape(mp // fold, fold * kp)

    kernel = functools.partial(_fused_convbn_kernel, apply_relu=apply_relu)
    out = pl.pallas_call(
        kernel,
        out_shape=jax.ShapeDtypeStruct((mp // fold, ncols), out_dtype),
        grid=(grid_m,),
        in_specs=[
            pl.BlockSpec((bm // fold, fold * kp), lambda i: (i, 0)),
            pl.BlockSpec((fold * kp, ncols), lambda i: (0, 0)),
            pl.BlockSpec((1, ncols), lambda i: (0, 0)),
        ],
        out_specs=pl.BlockSpec((bm // fold, ncols), lambda i: (i, 0)),
        compiler_params=pltpu.CompilerParams(
            dimension_semantics=("parallel",),
            vmem_limit_bytes=_vmem_limit_bytes(),
        ),
    )(patches, layer.w_call, layer.b_call)

    if fold > 1:
        out = out.reshape(mp, cout)                 # undo the row fold
    elif ncols != cout:
        out = out[:, :cout]                         # drop padded columns
    out = out[:m]                                   # drop padded rows
    return out.reshape(b, ho, wo, cout)


def patch_embed_small(x_nchw, prepared, *, final_dtype=jnp.float32):
    """PatchEmbedSmall forward: 3x (Conv2dBN), ReLU after the first two."""
    x = jnp.transpose(x_nchw, (0, 2, 3, 1))              # NCHW -> NHWC
    n = len(prepared)
    for idx, layer in enumerate(prepared):
        last = idx == n - 1
        x = conv2d_bn_act(x, layer, apply_relu=not last,
                          out_dtype=final_dtype if last else jnp.bfloat16)
    return jnp.transpose(x, (0, 3, 1, 2))                # NHWC -> NCHW


# ----------------------------------------------------------------------------
# parameter init (matches the PyTorch module defaults) and f32 reference
# ----------------------------------------------------------------------------
def init_patch_embed_small_params(key, in_chans, embed_dim):
    dims = [in_chans, embed_dim // 4, embed_dim // 2, embed_dim]
    params = []
    for i in range(3):
        key, wk = jax.random.split(key)
        cin, cout = dims[i], dims[i + 1]
        w = jax.random.normal(wk, (cout, cin, 3, 3), jnp.float32) / jnp.sqrt(9.0 * cin)
        bn = dict(gamma=jnp.ones((cout,), jnp.float32),   # bn_weight_init=1
                  beta=jnp.zeros((cout,), jnp.float32),   # bias init 0
                  mean=jnp.zeros((cout,), jnp.float32),   # running_mean default
                  var=jnp.ones((cout,), jnp.float32),     # running_var default
                  eps=1e-5)
        params.append((w, bn))
    return params


def _reference_forward(x_nchw, params):
    """Pure-JAX f32 reference (lax.conv) for correctness checking."""
    x = x_nchw
    for idx, (w, bn) in enumerate(params):
        x = jax.lax.conv_general_dilated(
            x, w, window_strides=(2, 2), padding=((1, 1), (1, 1)),
            dimension_numbers=("NCHW", "OIHW", "NCHW"))
        scale = bn["gamma"] / jnp.sqrt(bn["var"] + bn["eps"])
        bias = bn["beta"] - bn["mean"] * scale
        x = x * scale[None, :, None, None] + bias[None, :, None, None]
        if idx < len(params) - 1:
            x = jnp.maximum(x, 0.0)
    return x


if __name__ == "__main__":
    key = jax.random.PRNGKey(0)
    k_x, k_p = jax.random.split(key)

    B, in_chans, resolution, embed_dim = 2, 4, 16, 32
    x = jax.random.normal(k_x, (B, in_chans, resolution, resolution), jnp.float32)
    params = init_patch_embed_small_params(k_p, in_chans, embed_dim)

    # Weight prep runs once, outside the jitted per-forward path.
    prepared = prepare_patch_embed_params(params)

    fwd = jax.jit(lambda xx: patch_embed_small(xx, prepared))
    out = jax.block_until_ready(fwd(x))

    assert out.shape == (B, embed_dim, resolution // 8, resolution // 8), out.shape

    ref = jax.block_until_ready(_reference_forward(x, params))
    # bf16 matmul path vs f32 reference: check relative L2 error (bugs give ~1.0).
    rel_err = float(jnp.linalg.norm(out.astype(jnp.float32) - ref)
                    / (jnp.linalg.norm(ref) + 1e-12))
    assert rel_err < 8e-2, rel_err

    print("KERNEL_OK")
</pallas_src>

<mosaic_0001>
module attributes {stable_mosaic.version = 11 : i64} {
  func.func @_fused_convbn_kernel(%arg0: i32, %arg1: memref<8x768xbf16, #tpu.memory_space<vmem>>, %arg2: memref<768x128xbf16, #tpu.memory_space<vmem>>, %arg3: memref<1x128xf32, #tpu.memory_space<vmem>>, %arg4: memref<8x128xbf16, #tpu.memory_space<vmem>>) attributes {dimension_semantics = [#tpu.dimension_semantics<parallel>], iteration_bounds = array<i64: 1>, scalar_prefetch = 0 : i64, scratch_operands = 0 : i64, tpu.core_type = #tpu.core_type<tc>, window_params = [{transform_indices = @transform_0, window_bounds = array<i64: 8, 768>}, {pipeline_mode = #tpu.pipeline_mode<synchronous>, transform_indices = @transform_1, window_bounds = array<i64: 768, 128>}, {pipeline_mode = #tpu.pipeline_mode<synchronous>, transform_indices = @transform_2, window_bounds = array<i64: 1, 128>}, {transform_indices = @transform_3, window_bounds = array<i64: 8, 128>}]} {
    %c0 = arith.constant 0 : index
    %c0_0 = arith.constant 0 : index
    %0 = vector.load %arg1[%c0, %c0_0] : memref<8x768xbf16, #tpu.memory_space<vmem>>, vector<8x768xbf16>
    %c0_1 = arith.constant 0 : index
    %c0_2 = arith.constant 0 : index
    %1 = vector.load %arg2[%c0_1, %c0_2] : memref<768x128xbf16, #tpu.memory_space<vmem>>, vector<768x128xbf16>
    %cst = arith.constant dense<0.000000e+00> : vector<8x128xf32>
    %2 = tpu.matmul %0, %1, %cst {dimension_numbers = #tpu.dot_dimension_numbers<[1], [0], [0], [1], [0, 0, 1, 1], [], []>} : vector<8x768xbf16>, vector<768x128xbf16>, vector<8x128xf32> -> vector<8x128xf32>
    %c0_3 = arith.constant 0 : index
    %c0_4 = arith.constant 0 : index
    %3 = vector.load %arg3[%c0_3, %c0_4] : memref<1x128xf32, #tpu.memory_space<vmem>>, vector<1x128xf32>
    %4 = vector.broadcast %3 : vector<1x128xf32> to vector<8x128xf32>
    %5 = arith.addf %2, %4 : vector<8x128xf32>
    %cst_5 = arith.constant 0.000000e+00 : f32
    %6 = vector.broadcast %cst_5 : f32 to vector<8x128xf32>
    %7 = arith.maximumf %5, %6 : vector<8x128xf32>
    %8 = arith.truncf %7 : vector<8x128xf32> to vector<8x128xbf16>
    %c0_6 = arith.constant 0 : index
    %c0_7 = arith.constant 0 : index
    %9 = vector.load %arg4[%c0_6, %c0_7] : memref<8x128xbf16, #tpu.memory_space<vmem>>, vector<8x128xbf16>
    tpu.vector_store %arg4[%c0_6, %c0_7], %8 {strides = array<i32>} : memref<8x128xbf16, #tpu.memory_space<vmem>>, vector<8x128xbf16>,
    return
  }
  func.func @transform_0(%arg0: i32) -> (i32, i32) {
    %c0_i32 = arith.constant 0 : i32
    %c0_i32_0 = arith.constant 0 : i32
    return %arg0, %c0_i32 : i32, i32
  }
  func.func @transform_1(%arg0: i32) -> (i32, i32) {
    %c0_i32 = arith.constant 0 : i32
    %c0_i32_0 = arith.constant 0 : i32
    %c0_i32_1 = arith.constant 0 : i32
    return %c0_i32, %c0_i32_0 : i32, i32
  }
  func.func @transform_2(%arg0: i32) -> (i32, i32) {
    %c0_i32 = arith.constant 0 : i32
    %c0_i32_0 = arith.constant 0 : i32
    %c0_i32_1 = arith.constant 0 : i32
    return %c0_i32, %c0_i32_0 : i32, i32
  }
  func.func @transform_3(%arg0: i32) -> (i32, i32) {
    %c0_i32 = arith.constant 0 : i32
    %c0_i32_0 = arith.constant 0 : i32
    return %arg0, %c0_i32 : i32, i32
  }
}

module attributes {stable_mosaic.version = 11 : i64} {
  func.func @_fused_convbn_kernel(%arg0: i32, %arg1: memref<8x640xbf16, #tpu.memory_space<vmem>>, %arg2: memref<640x128xbf16, #tpu.memory_space<vmem>>, %arg3: memref<1x128xf32, #tpu.memory_space<vmem>>, %arg4: memref<8x128xbf16, #tpu.memory_space<vmem>>) attributes {dimension_semantics = [#tpu.dimension_semantics<parallel>], iteration_bounds = array<i64: 1>, scalar_prefetch = 0 : i64, scratch_operands = 0 : i64, tpu.core_type = #tpu.core_type<tc>, window_params = [{transform_indices = @transform_0, window_bounds = array<i64: 8, 640>}, {pipeline_mode = #tpu.pipeline_mode<synchronous>, transform_indices = @transform_1, window_bounds = array<i64: 640, 128>}, {pipeline_mode = #tpu.pipeline_mode<synchronous>, transform_indices = @transform_2, window_bounds = array<i64: 1, 128>}, {transform_indices = @transform_3, window_bounds = array<i64: 8, 128>}]} {
    %c0 = arith.constant 0 : index
    %c0_0 = arith.constant 0 : index
    %0 = vector.load %arg1[%c0, %c0_0] : memref<8x640xbf16, #tpu.memory_space<vmem>>, vector<8x640xbf16>
    %c0_1 = arith.constant 0 : index
    %c0_2 = arith.constant 0 : index
    %1 = vector.load %arg2[%c0_1, %c0_2] : memref<640x128xbf16, #tpu.memory_space<vmem>>, vector<640x128xbf16>
    %cst = arith.constant dense<0.000000e+00> : vector<8x128xf32>
    %2 = tpu.matmul %0, %1, %cst {dimension_numbers = #tpu.dot_dimension_numbers<[1], [0], [0], [1], [0, 0, 1, 1], [], []>} : vector<8x640xbf16>, vector<640x128xbf16>, vector<8x128xf32> -> vector<8x128xf32>
    %c0_3 = arith.constant 0 : index
    %c0_4 = arith.constant 0 : index
    %3 = vector.load %arg3[%c0_3, %c0_4] : memref<1x128xf32, #tpu.memory_space<vmem>>, vector<1x128xf32>
    %4 = vector.broadcast %3 : vector<1x128xf32> to vector<8x128xf32>
    %5 = arith.addf %2, %4 : vector<8x128xf32>
    %cst_5 = arith.constant 0.000000e+00 : f32
    %6 = vector.broadcast %cst_5 : f32 to vector<8x128xf32>
    %7 = arith.maximumf %5, %6 : vector<8x128xf32>
    %8 = arith.truncf %7 : vector<8x128xf32> to vector<8x128xbf16>
    %c0_6 = arith.constant 0 : index
    %c0_7 = arith.constant 0 : index
    %9 = vector.load %arg4[%c0_6, %c0_7] : memref<8x128xbf16, #tpu.memory_space<vmem>>, vector<8x128xbf16>
    tpu.vector_store %arg4[%c0_6, %c0_7], %8 {strides = array<i32>} : memref<8x128xbf16, #tpu.memory_space<vmem>>, vector<8x128xbf16>,
    return
  }
  func.func @transform_0(%arg0: i32) -> (i32, i32) {
    %c0_i32 = arith.constant 0 : i32
    %c0_i32_0 = arith.constant 0 : i32
    return %arg0, %c0_i32 : i32, i32
  }
  func.func @transform_1(%arg0: i32) -> (i32, i32) {
    %c0_i32 = arith.constant 0 : i32
    %c0_i32_0 = arith.constant 0 : i32
    %c0_i32_1 = arith.constant 0 : i32
    return %c0_i32, %c0_i32_0 : i32, i32
  }
  func.func @transform_2(%arg0: i32) -> (i32, i32) {
    %c0_i32 = arith.constant 0 : i32
    %c0_i32_0 = arith.constant 0 : i32
    %c0_i32_1 = arith.constant 0 : i32
    return %c0_i32, %c0_i32_0 : i32, i32
  }
  func.func @transform_3(%arg0: i32) -> (i32, i32) {
    %c0_i32 = arith.constant 0 : i32
    %c0_i32_0 = arith.constant 0 : i32
    return %arg0, %c0_i32 : i32, i32
  }
}

module attributes {stable_mosaic.version = 11 : i64} {
  func.func @_fused_convbn_kernel(%arg0: i32, %arg1: memref<8x640xbf16, #tpu.memory_space<vmem>>, %arg2: memref<640x128xbf16, #tpu.memory_space<vmem>>, %arg3: memref<1x128xf32, #tpu.memory_space<vmem>>, %arg4: memref<8x128xf32, #tpu.memory_space<vmem>>) attributes {dimension_semantics = [#tpu.dimension_semantics<parallel>], iteration_bounds = array<i64: 1>, scalar_prefetch = 0 : i64, scratch_operands = 0 : i64, tpu.core_type = #tpu.core_type<tc>, window_params = [{transform_indices = @transform_0, window_bounds = array<i64: 8, 640>}, {pipeline_mode = #tpu.pipeline_mode<synchronous>, transform_indices = @transform_1, window_bounds = array<i64: 640, 128>}, {pipeline_mode = #tpu.pipeline_mode<synchronous>, transform_indices = @transform_2, window_bounds = array<i64: 1, 128>}, {transform_indices = @transform_3, window_bounds = array<i64: 8, 128>}]} {
    %c0 = arith.constant 0 : index
    %c0_0 = arith.constant 0 : index
    %0 = vector.load %arg1[%c0, %c0_0] : memref<8x640xbf16, #tpu.memory_space<vmem>>, vector<8x640xbf16>
    %c0_1 = arith.constant 0 : index
    %c0_2 = arith.constant 0 : index
    %1 = vector.load %arg2[%c0_1, %c0_2] : memref<640x128xbf16, #tpu.memory_space<vmem>>, vector<640x128xbf16>
    %cst = arith.constant dense<0.000000e+00> : vector<8x128xf32>
    %2 = tpu.matmul %0, %1, %cst {dimension_numbers = #tpu.dot_dimension_numbers<[1], [0], [0], [1], [0, 0, 1, 1], [], []>} : vector<8x640xbf16>, vector<640x128xbf16>, vector<8x128xf32> -> vector<8x128xf32>
    %c0_3 = arith.constant 0 : index
    %c0_4 = arith.constant 0 : index
    %3 = vector.load %arg3[%c0_3, %c0_4] : memref<1x128xf32, #tpu.memory_space<vmem>>, vector<1x128xf32>
    %4 = vector.broadcast %3 : vector<1x128xf32> to vector<8x128xf32>
    %5 = arith.addf %2, %4 : vector<8x128xf32>
    %c0_5 = arith.constant 0 : index
    %c0_6 = arith.constant 0 : index
    %6 = vector.load %arg4[%c0_5, %c0_6] : memref<8x128xf32, #tpu.memory_space<vmem>>, vector<8x128xf32>
    tpu.vector_store %arg4[%c0_5, %c0_6], %5 {strides = array<i32>} : memref<8x128xf32, #tpu.memory_space<vmem>>, vector<8x128xf32>,
    return
  }
  func.func @transform_0(%arg0: i32) -> (i32, i32) {
    %c0_i32 = arith.constant 0 : i32
    %c0_i32_0 = arith.constant 0 : i32
    return %arg0, %c0_i32 : i32, i32
  }
  func.func @transform_1(%arg0: i32) -> (i32, i32) {
    %c0_i32 = arith.constant 0 : i32
    %c0_i32_0 = arith.constant 0 : i32
    %c0_i32_1 = arith.constant 0 : i32
    return %c0_i32, %c0_i32_0 : i32, i32
  }
  func.func @transform_2(%arg0: i32) -> (i32, i32) {
    %c0_i32 = arith.constant 0 : i32
    %c0_i32_0 = arith.constant 0 : i32
    %c0_i32_1 = arith.constant 0 : i32
    return %c0_i32, %c0_i32_0 : i32, i32
  }
  func.func @transform_3(%arg0: i32) -> (i32, i32) {
    %c0_i32 = arith.constant 0 : i32
    %c0_i32_0 = arith.constant 0 : i32
    return %arg0, %c0_i32 : i32, i32
  }
}

</mosaic_0001>

<bundles_post_ra>
// kernel: _lambda_.4
= control target key start
LH: loop header
LB: loop body
LE: loop exit
PB: predicated region body
PF: predicated region fallthrough
CT: control target
= control target key end

     0   :  { %v656_v35 = vmov 0.0   ;;  %vm657_vm0 = vmmov 0   ;;  %s813_s1 = inlined_call_operand.vmem [shape: bf16[640,128], index: 1, kind: input, shape index: {}]   ;;  %s814_s0 = inlined_call_operand.vmem [shape: bf16[8,640], index: 0, kind: input, shape index: {}]   ;;  %s815_s2 = inlined_call_operand.vmem [shape: f32[1,128], index: 2, kind: input, shape index: {}]   ;;  %s816_s3 = inlined_call_operand.vmem [shape: bf16[8,128], index: 3, kind: output, shape index: {}]  }
   0x1   :  { %v611_v0 = vld [vmem:[%s813_s1 + $0x78] sm:$0xff]   ;;  %v615_v4 = vld [vmem:[%s813_s1 + $0x70] sm:$0xff]   ;;  %v619_v8 = vld [vmem:[%s813_s1 + $0x68] sm:$0xff]  }
   0x2   :  { %v612_v1 = vld [vmem:[%s813_s1 + $0x38] sm:$0xff]   ;;  %536 = vmatprep.subr.bf16.mxu0 %v611_v0  ;;  %v616_v5 = vld [vmem:[%s813_s1 + $0x30] sm:$0xff]   ;;  %v620_v9 = vld [vmem:[%s813_s1 + $0x28] sm:$0xff]  }
   0x3   :  { %v613_v2 = vld [vmem:[%s813_s1 + $0xf8] sm:$0xff]   ;;  %537 = vmatpush3.bf16.msra.mxu0 %v612_v1  ;;  %v617_v6 = vld [vmem:[%s813_s1 + $0xf0] sm:$0xff]   ;;  %v621_v10 = vld [vmem:[%s813_s1 + $0xe8] sm:$0xff]  }
   0x4   :  { %v614_v3 = vld [vmem:[%s813_s1 + $0xb8] sm:$0xff]   ;;  %558 = vmatprep.subr.bf16.mxu1 %v613_v2  ;;  %538 = vmatprep.subr.bf16.mxu0 %v615_v4  ;;  %v618_v7 = vld [vmem:[%s813_s1 + $0xb0] sm:$0xff]   ;;  %v622_v11 = vld [vmem:[%s813_s1 + $0xa8] sm:$0xff]  }
   0x5   :  { %559 = vmatpush3.bf16.msra.mxu1 %v614_v3  ;;  %v623_v12 = vld [vmem:[%s813_s1 + $0x60] sm:$0xff]   ;;  %v627_v16 = vld [vmem:[%s813_s1 + $0x58] sm:$0xff]   ;;  %v631_v20 = vld [vmem:[%s813_s1 + $0x50] sm:$0xff]  }
   0x6   :  { %560 = vmatprep.subr.bf16.mxu1 %v617_v6  ;;  %v624_v13 = vld [vmem:[%s813_s1 + $0x20] sm:$0xff]   ;;  %v628_v17 = vld [vmem:[%s813_s1 + $0x18] sm:$0xff]   ;;  %v632_v21 = vld [vmem:[%s813_s1 + $0x10] sm:$0xff]  }
   0x7   :  { %539 = vmatpush3.bf16.msra.mxu0 %v616_v5  ;;  %v625_v14 = vld [vmem:[%s813_s1 + $0xe0] sm:$0xff]   ;;  %v629_v18 = vld [vmem:[%s813_s1 + $0xd8] sm:$0xff]   ;;  %v633_v22 = vld [vmem:[%s813_s1 + $0xd0] sm:$0xff]  }
   0x8   :  { %540 = vmatprep.subr.bf16.mxu0 %v619_v8  ;;  %v626_v15 = vld [vmem:[%s813_s1 + $0xa0] sm:$0xff]   ;;  %v630_v19 = vld [vmem:[%s813_s1 + $0x98] sm:$0xff]   ;;  %v634_v23 = vld [vmem:[%s813_s1 + $0x90] sm:$0xff]  }
   0x9   :  { %561 = vmatpush3.bf16.msra.mxu1 %v618_v7  ;;  %v635_v24 = vld [vmem:[%s813_s1 + $0x48] sm:$0xff]   ;;  %v639_v28 = vld [vmem:[%s813_s1 + $0x40] sm:$0xff]   ;;  %v648_v39 = vld [vmem:[%s813_s1 + $0x138] sm:$0xff]  }
   0xa   :  { %562 = vmatprep.subr.bf16.mxu1 %v621_v10  ;;  %v636_v25 = vld [vmem:[%s813_s1 + $0x8] sm:$0xff]   ;;  %v640_v29 = vld [vmem:[%s813_s1] sm:$0xff]   ;;  %v649_v40 = vld [vmem:[%s813_s1 + $0x130] sm:$0xff]  }
   0xb   :  { %541 = vmatpush3.bf16.msra.mxu0 %v620_v9  ;;  %v637_v26 = vld [vmem:[%s813_s1 + $0xc8] sm:$0xff]   ;;  %v641_v30 = vld [vmem:[%s813_s1 + $0xc0] sm:$0xff]   ;;  %v652_v43 = vld [vmem:[%s813_s1 + $0x118] sm:$0xff]  }
   0xc   :  { %542 = vmatprep.subr.bf16.mxu0 %v623_v12  ;;  %v638_v27 = vld [vmem:[%s813_s1 + $0x88] sm:$0xff]   ;;  %v15_v31 = vld [vmem:[%s814_s0] sm:$0xff]  ;;  %v653_v44 = vld [vmem:[%s813_s1 + $0x110] sm:$0xff]  }
   0xd   :  { %563 = vmatpush3.bf16.msra.mxu1 %v622_v11  ;;  %v491_v32 = vcombine.low %v15_v31, %v15_v31  ;;  %v492_v33 = vcombine.high %v15_v31, %v15_v31  ;;  %v645_v34 = vld [vmem:[%s813_s1 + $0x80] sm:$0xff]   ;;  %v16_v36 = vld [vmem:[%s814_s0 + $0x8] sm:$0xff]  ;;  %v644_v47 = vld [vmem:[%s814_s0 + $0x10] ss:$0 sps:$4 sm:$0xff]  }
   0xe   :  { %564 = vmatprep.subr.bf16.mxu1 %v625_v14  ;;  %v493_v37 = vcombine.low %v16_v36, %v16_v36  ;;  %v494_v38 = vcombine.high %v16_v36, %v16_v36  ;;  %v650_v41 = vld [vmem:[%s813_s1 + $0x128] sm:$0xff]   ;;  %v651_v42 = vld [vmem:[%s813_s1 + $0x120] sm:$0xff]  }
   0xf   :  { %543 = vmatpush3.bf16.msra.mxu0 %v624_v13  ;;  %395 = vmatprep.mubr.bf16.mxu0 %v492_v33  ;;  %v654_v45 = vld [vmem:[%s813_s1 + $0x108] sm:$0xff]   ;;  %v655_v46 = vld [vmem:[%s813_s1 + $0x100] sm:$0xff]  }
  0x10   :  { %544 = vmatprep.subr.bf16.mxu0 %v627_v16  ;;  %435 = vmatprep.mubr.bf16.mxu1 %v494_v38  ;;  %v490_v57 = vld [vmem:[%s815_s2] ss:$0 sm:$0xff] }
  0x11   :  { %565 = vmatpush3.bf16.msra.mxu1 %v626_v15 }
  0x12   :  { %566 = vmatprep.subr.bf16.mxu1 %v629_v18 }
  0x13   :  { %545 = vmatpush3.bf16.msra.mxu0 %v628_v17 }
  0x14   :  { %546 = vmatprep.subr.bf16.mxu0 %v631_v20 }
  0x15   :  { %567 = vmatpush3.bf16.msra.mxu1 %v630_v19 }
  0x16   :  { %568 = vmatprep.subr.bf16.mxu1 %v633_v22 }
  0x17   :  { %547 = vmatpush3.bf16.msra.mxu0 %v632_v21 }
  0x18   :  { %548 = vmatprep.subr.bf16.mxu0 %v635_v24 }
  0x19   :  { %569 = vmatpush3.bf16.msra.mxu1 %v634_v23 }
  0x1a   :  { %570 = vmatprep.subr.bf16.mxu1 %v637_v26 }
  0x1b   :  { %549 = vmatpush3.bf16.msra.mxu0 %v636_v25 }
  0x1c   :  { %550 = vmatprep.subr.bf16.mxu0 %v639_v28 }
  0x1d   :  { %571 = vmatpush3.bf16.msra.mxu1 %v638_v27 }
  0x1e   :  { %572 = vmatprep.subr.bf16.mxu1 %v641_v30 }
  0x1f   :  { %551 = vmatpush3.bf16.msra.mxu0 %v640_v29 }
  0x20   :  { %589 = vmatprep.subr.bf16.mxu0 %v656_v35 }
  0x21   :  { %573 = vmatpush3.bf16.msra.mxu1 %v645_v34 }
  0x22   :  { %396 = vmatmul.mubr.bf16.vlgmr.msra.gmra.mxu0 %v491_v32 }
  0x23   :  { %590 = vmatpush3.bf16.msra.mxu0 %v648_v39  ;;  %605 = vmatprep.mubr.msk.bf16.mxu0 %vm657_vm0, %v656_v35 }
  0x24   :  { %436 = vmatmul.mubr.bf16.vlgmr.msra.gmra.mxu1 %v493_v37  ;;  %591 = vmatprep.subr.bf16.mxu0 %v656_v35 }
  0x27   :  { %592 = vmatpush3.bf16.msra.mxu0 %v649_v40 }
  0x28   :  { %593 = vmatprep.subr.bf16.mxu0 %v656_v35 }
  0x2b   :  { %594 = vmatpush3.bf16.msra.mxu0 %v650_v41 }
  0x2c   :  { %595 = vmatprep.subr.bf16.mxu0 %v656_v35 }
  0x2f   :  { %596 = vmatpush3.bf16.msra.mxu0 %v651_v42 }
  0x30   :  { %597 = vmatprep.subr.bf16.mxu0 %v656_v35 }
  0x33   :  { %598 = vmatpush3.bf16.msra.mxu0 %v652_v43 }
  0x34   :  { %599 = vmatprep.subr.bf16.mxu0 %v656_v35 }
  0x37   :  { %600 = vmatpush3.bf16.msra.mxu0 %v653_v44 }
  0x38   :  { %601 = vmatprep.subr.bf16.mxu0 %v656_v35 }
  0x3b   :  { %602 = vmatpush3.bf16.msra.mxu0 %v654_v45 }
  0x3c   :  { %603 = vmatprep.subr.bf16.mxu0 %v656_v35 }
  0x3f   :  { %604 = vmatpush3.bf16.msra.mxu0 %v655_v46 }
  0x42   :  { %606 = vmatmul.mubr.bf16.vlgmr.msra.gmra.mxu0 %v644_v47 }
  0xe2   :  { %v552_v48 = vpop.f32.mrf.mxu0 }
  0xe4   :  { %v553_v49 = vpop.f32.mrf.mxu0  ;;  %v574_v50 = vpop.f32.mrf.mxu1 }
  0xe5   :  { %v554_v56 = vadd.f32 %v553_v49, %v552_v48 }
  0xe6   :  { %v555_v51 = vpop.f32.mrf.mxu0  ;;  %v575_v52 = vpop.f32.mrf.mxu1 }
  0xe7   :  { %v398_v58 = vadd.f32 %v554_v56, %v490_v57  ;;  %v576_v59 = vadd.f32 %v575_v52, %v574_v50 }
  0xe8   :  { %v556_v53 = vpop.f32.mrf.mxu0  ;;  %v577_v54 = vpop.f32.mrf.mxu1 }
  0xe9   :  { %v438_v60 = vadd.f32 %v576_v59, %v398_v58 }
  0xea   :  { %v578_v55 = vpop.f32.mrf.mxu1 }
 0x102   :  { %v477_v61 = vpop.f32.mrf.mxu0 }
 0x103   :  { %v478_v62 = vadd.f32 %v477_v61, %v438_v60 }
 0x104   :  { %v607_v63 = vpop.f32.mrf.mxu0 }
 0x105   :  { %v483_v0 = vmax.f32 %v478_v62, 0.0 }
 0x106   :  { %v480_v1 = vpop.f32.mrf.mxu0 }
 0x107   :  { %v484_v2 = vpack.c.bf16 %v483_v0, %v483_v0 }
 0x108   :  { %v608_v3 = vpop.f32.mrf.mxu0 }
 0x109   :  { %485 = vst [vmem:[%s816_s3] sm:$0xf] %v484_v2 }

// kernel: _lambda_.3
= control target key start
LH: loop header
LB: loop body
LE: loop exit
PB: predicated region body
PF: predicated region fallthrough
CT: control target
= control target key end

     0   :  { %s911_s1 = inlined_call_operand.vmem [shape: bf16[768,128], index: 1, kind: input, shape index: {}]   ;;  %s912_s0 = inlined_call_operand.vmem [shape: bf16[8,768], index: 0, kind: input, shape index: {}]   ;;  %s913_s2 = inlined_call_operand.vmem [shape: f32[1,128], index: 2, kind: input, shape index: {}]   ;;  %s914_s3 = inlined_call_operand.vmem [shape: bf16[8,128], index: 3, kind: output, shape index: {}]  }
   0x1   :  { %v678_v0 = vld [vmem:[%s911_s1 + $0x78] sm:$0xff]   ;;  %v682_v4 = vld [vmem:[%s911_s1 + $0x70] sm:$0xff]   ;;  %v686_v8 = vld [vmem:[%s911_s1 + $0x68] sm:$0xff]  }
   0x2   :  { %v679_v1 = vld [vmem:[%s911_s1 + $0x38] sm:$0xff]   ;;  %612 = vmatprep.subr.bf16.mxu0 %v678_v0  ;;  %v683_v5 = vld [vmem:[%s911_s1 + $0x30] sm:$0xff]   ;;  %v687_v9 = vld [vmem:[%s911_s1 + $0x28] sm:$0xff]  }
   0x3   :  { %v680_v2 = vld [vmem:[%s911_s1 + $0xf8] sm:$0xff]   ;;  %613 = vmatpush3.bf16.msra.mxu0 %v679_v1  ;;  %v684_v6 = vld [vmem:[%s911_s1 + $0xf0] sm:$0xff]   ;;  %v688_v10 = vld [vmem:[%s911_s1 + $0xe8] sm:$0xff]  }
   0x4   :  { %v681_v3 = vld [vmem:[%s911_s1 + $0xb8] sm:$0xff]   ;;  %634 = vmatprep.subr.bf16.mxu1 %v680_v2  ;;  %614 = vmatprep.subr.bf16.mxu0 %v682_v4  ;;  %v685_v7 = vld [vmem:[%s911_s1 + $0xb0] sm:$0xff]   ;;  %v689_v11 = vld [vmem:[%s911_s1 + $0xa8] sm:$0xff]  }
   0x5   :  { %635 = vmatpush3.bf16.msra.mxu1 %v681_v3  ;;  %v690_v12 = vld [vmem:[%s911_s1 + $0x60] sm:$0xff]   ;;  %v694_v16 = vld [vmem:[%s911_s1 + $0x58] sm:$0xff]   ;;  %v698_v20 = vld [vmem:[%s911_s1 + $0x50] sm:$0xff]  }
   0x6   :  { %636 = vmatprep.subr.bf16.mxu1 %v684_v6  ;;  %v691_v13 = vld [vmem:[%s911_s1 + $0x20] sm:$0xff]   ;;  %v695_v17 = vld [vmem:[%s911_s1 + $0x18] sm:$0xff]   ;;  %v699_v21 = vld [vmem:[%s911_s1 + $0x10] sm:$0xff]  }
   0x7   :  { %615 = vmatpush3.bf16.msra.mxu0 %v683_v5  ;;  %v692_v14 = vld [vmem:[%s911_s1 + $0xe0] sm:$0xff]   ;;  %v696_v18 = vld [vmem:[%s911_s1 + $0xd8] sm:$0xff]   ;;  %v700_v22 = vld [vmem:[%s911_s1 + $0xd0] sm:$0xff]  }
   0x8   :  { %616 = vmatprep.subr.bf16.mxu0 %v686_v8  ;;  %v693_v15 = vld [vmem:[%s911_s1 + $0xa0] sm:$0xff]   ;;  %v697_v19 = vld [vmem:[%s911_s1 + $0x98] sm:$0xff]   ;;  %v701_v23 = vld [vmem:[%s911_s1 + $0x90] sm:$0xff]  }
   0x9   :  { %637 = vmatpush3.bf16.msra.mxu1 %v685_v7  ;;  %v702_v24 = vld [vmem:[%s911_s1 + $0x48] sm:$0xff]   ;;  %v706_v28 = vld [vmem:[%s911_s1 + $0x40] sm:$0xff]   ;;  %v712_v35 = vld [vmem:[%s911_s1 + $0x178] sm:$0xff]  }
   0xa   :  { %638 = vmatprep.subr.bf16.mxu1 %v688_v10  ;;  %v703_v25 = vld [vmem:[%s911_s1 + $0x8] sm:$0xff]   ;;  %v707_v29 = vld [vmem:[%s911_s1] sm:$0xff]   ;;  %v715_v39 = vld [vmem:[%s911_s1 + $0x138] sm:$0xff]  }
   0xb   :  { %617 = vmatpush3.bf16.msra.mxu0 %v687_v9  ;;  %v704_v26 = vld [vmem:[%s911_s1 + $0xc8] sm:$0xff]   ;;  %v708_v30 = vld [vmem:[%s911_s1 + $0xc0] sm:$0xff]   ;;  %v716_v40 = vld [vmem:[%s911_s1 + $0x170] sm:$0xff]  }
   0xc   :  { %618 = vmatprep.subr.bf16.mxu0 %v690_v12  ;;  %v705_v27 = vld [vmem:[%s911_s1 + $0x88] sm:$0xff]   ;;  %v15_v31 = vld [vmem:[%s912_s0] sm:$0xff]  ;;  %v717_v41 = vld [vmem:[%s911_s1 + $0x130] sm:$0xff]  }
   0xd   :  { %639 = vmatpush3.bf16.msra.mxu1 %v689_v11  ;;  %v558_v32 = vcombine.low %v15_v31, %v15_v31  ;;  %v559_v33 = vcombine.high %v15_v31, %v15_v31  ;;  %v711_v34 = vld [vmem:[%s911_s1 + $0x80] sm:$0xff]   ;;  %v16_v36 = vld [vmem:[%s912_s0 + $0x8] sm:$0xff]  ;;  %v722_v46 = vld [vmem:[%s911_s1 + $0x158] sm:$0xff]  }
   0xe   :  { %640 = vmatprep.subr.bf16.mxu1 %v692_v14  ;;  %v560_v37 = vcombine.low %v16_v36, %v16_v36  ;;  %v561_v38 = vcombine.high %v16_v36, %v16_v36  ;;  %v718_v42 = vld [vmem:[%s911_s1 + $0x168] sm:$0xff]   ;;  %v720_v44 = vld [vmem:[%s911_s1 + $0x160] sm:$0xff]   ;;  %v723_v47 = vld [vmem:[%s911_s1 + $0x118] sm:$0xff]  }
   0xf   :  { %619 = vmatpush3.bf16.msra.mxu0 %v691_v13  ;;  %462 = vmatprep.mubr.bf16.mxu0 %v559_v33  ;;  %v719_v43 = vld [vmem:[%s911_s1 + $0x128] sm:$0xff]   ;;  %v721_v45 = vld [vmem:[%s911_s1 + $0x120] sm:$0xff]   ;;  %v17_v48 = vld [vmem:[%s912_s0 + $0x10] sm:$0xff] }
  0x10   :  { %620 = vmatprep.subr.bf16.mxu0 %v694_v16  ;;  %502 = vmatprep.mubr.bf16.mxu1 %v561_v38  ;;  %v724_v49 = vld [vmem:[%s911_s1 + $0x150] sm:$0xff]   ;;  %v563_v50 = vcombine.high %v17_v48, %v17_v48  ;;  %v726_v52 = vld [vmem:[%s911_s1 + $0x148] sm:$0xff]   ;;  %v728_v54 = vld [vmem:[%s911_s1 + $0x140] sm:$0xff]   ;;  %v562_v56 = vcombine.low %v17_v48, %v17_v48 }
  0x11   :  { %641 = vmatpush3.bf16.msra.mxu1 %v693_v15  ;;  %v725_v51 = vld [vmem:[%s911_s1 + $0x110] sm:$0xff]   ;;  %v727_v53 = vld [vmem:[%s911_s1 + $0x108] sm:$0xff]   ;;  %v729_v55 = vld [vmem:[%s911_s1 + $0x100] sm:$0xff]  }
  0x12   :  { %642 = vmatprep.subr.bf16.mxu1 %v696_v18  ;;  %v557_v2 = vld [vmem:[%s913_s2] ss:$0 sm:$0xff] }
  0x13   :  { %621 = vmatpush3.bf16.msra.mxu0 %v695_v17 }
  0x14   :  { %622 = vmatprep.subr.bf16.mxu0 %v698_v20 }
  0x15   :  { %643 = vmatpush3.bf16.msra.mxu1 %v697_v19 }
  0x16   :  { %644 = vmatprep.subr.bf16.mxu1 %v700_v22 }
  0x17   :  { %623 = vmatpush3.bf16.msra.mxu0 %v699_v21 }
  0x18   :  { %624 = vmatprep.subr.bf16.mxu0 %v702_v24 }
  0x19   :  { %645 = vmatpush3.bf16.msra.mxu1 %v701_v23 }
  0x1a   :  { %646 = vmatprep.subr.bf16.mxu1 %v704_v26 }
  0x1b   :  { %625 = vmatpush3.bf16.msra.mxu0 %v703_v25 }
  0x1c   :  { %626 = vmatprep.subr.bf16.mxu0 %v706_v28 }
  0x1d   :  { %647 = vmatpush3.bf16.msra.mxu1 %v705_v27 }
  0x1e   :  { %648 = vmatprep.subr.bf16.mxu1 %v708_v30 }
  0x1f   :  { %627 = vmatpush3.bf16.msra.mxu0 %v707_v29 }
  0x20   :  { %656 = vmatprep.subr.bf16.mxu0 %v712_v35 }
  0x21   :  { %649 = vmatpush3.bf16.msra.mxu1 %v711_v34 }
  0x22   :  { %463 = vmatmul.mubr.bf16.vlgmr.msra.gmra.mxu0 %v558_v32 }
  0x23   :  { %657 = vmatpush3.bf16.msra.mxu0 %v715_v39  ;;  %542 = vmatprep.mubr.bf16.mxu0 %v563_v50 }
  0x24   :  { %503 = vmatmul.mubr.bf16.vlgmr.msra.gmra.mxu1 %v560_v37  ;;  %658 = vmatprep.subr.bf16.mxu0 %v716_v40 }
  0x27   :  { %659 = vmatpush3.bf16.msra.mxu0 %v717_v41 }
  0x28   :  { %660 = vmatprep.subr.bf16.mxu0 %v718_v42 }
  0x2b   :  { %661 = vmatpush3.bf16.msra.mxu0 %v719_v43 }
  0x2c   :  { %662 = vmatprep.subr.bf16.mxu0 %v720_v44 }
  0x2f   :  { %663 = vmatpush3.bf16.msra.mxu0 %v721_v45 }
  0x30   :  { %664 = vmatprep.subr.bf16.mxu0 %v722_v46 }
  0x33   :  { %665 = vmatpush3.bf16.msra.mxu0 %v723_v47 }
  0x34   :  { %666 = vmatprep.subr.bf16.mxu0 %v724_v49 }
  0x37   :  { %667 = vmatpush3.bf16.msra.mxu0 %v725_v51 }
  0x38   :  { %668 = vmatprep.subr.bf16.mxu0 %v726_v52 }
  0x3b   :  { %669 = vmatpush3.bf16.msra.mxu0 %v727_v53 }
  0x3c   :  { %670 = vmatprep.subr.bf16.mxu0 %v728_v54 }
  0x3f   :  { %671 = vmatpush3.bf16.msra.mxu0 %v729_v55 }
  0x42   :  { %543 = vmatmul.mubr.bf16.vlgmr.msra.gmra.mxu0 %v562_v56 }
  0xe2   :  { %v628_v57 = vpop.f32.mrf.mxu0 }
  0xe4   :  { %v629_v58 = vpop.f32.mrf.mxu0  ;;  %v650_v59 = vpop.f32.mrf.mxu1 }
  0xe5   :  { %v630_v1 = vadd.f32 %v629_v58, %v628_v57 }
  0xe6   :  { %v631_v60 = vpop.f32.mrf.mxu0  ;;  %v651_v61 = vpop.f32.mrf.mxu1 }
  0xe7   :  { %v465_v3 = vadd.f32 %v630_v1, %v557_v2  ;;  %v652_v4 = vadd.f32 %v651_v61, %v650_v59 }
  0xe8   :  { %v632_v62 = vpop.f32.mrf.mxu0  ;;  %v653_v63 = vpop.f32.mrf.mxu1 }
  0xe9   :  { %v505_v7 = vadd.f32 %v652_v4, %v465_v3 }
  0xea   :  { %v654_v0 = vpop.f32.mrf.mxu1 }
 0x102   :  { %v672_v5 = vpop.f32.mrf.mxu0 }
 0x104   :  { %v673_v6 = vpop.f32.mrf.mxu0 }
 0x105   :  { %v674_v8 = vadd.f32 %v673_v6, %v672_v5 }
 0x106   :  { %v675_v9 = vpop.f32.mrf.mxu0 }
 0x107   :  { %v545_v10 = vadd.f32 %v674_v8, %v505_v7 }
 0x108   :  { %v676_v11 = vpop.f32.mrf.mxu0 }
 0x109   :  { %v550_v12 = vmax.f32 %v545_v10, 0.0 }
 0x10b   :  { %v551_v13 = vpack.c.bf16 %v550_v12, %v550_v12 }
 0x10d   :  { %552 = vst [vmem:[%s914_s3] sm:$0xf] %v551_v13 }

// kernel: _lambda_.5
= control target key start
LH: loop header
LB: loop body
LE: loop exit
PB: predicated region body
PF: predicated region fallthrough
CT: control target
= control target key end

     0   :  { %v654_v35 = vmov 0.0   ;;  %vm655_vm0 = vmmov 0   ;;  %s811_s1 = inlined_call_operand.vmem [shape: bf16[640,128], index: 1, kind: input, shape index: {}]   ;;  %s812_s0 = inlined_call_operand.vmem [shape: bf16[8,640], index: 0, kind: input, shape index: {}]   ;;  %s813_s2 = inlined_call_operand.vmem [shape: f32[1,128], index: 2, kind: input, shape index: {}]   ;;  %s814_s3 = inlined_call_operand.vmem [shape: f32[8,128], index: 3, kind: output, shape index: {}]  }
   0x1   :  { %v609_v0 = vld [vmem:[%s811_s1 + $0x78] sm:$0xff]   ;;  %v613_v4 = vld [vmem:[%s811_s1 + $0x70] sm:$0xff]   ;;  %v617_v8 = vld [vmem:[%s811_s1 + $0x68] sm:$0xff]  }
   0x2   :  { %v610_v1 = vld [vmem:[%s811_s1 + $0x38] sm:$0xff]   ;;  %534 = vmatprep.subr.bf16.mxu0 %v609_v0  ;;  %v614_v5 = vld [vmem:[%s811_s1 + $0x30] sm:$0xff]   ;;  %v618_v9 = vld [vmem:[%s811_s1 + $0x28] sm:$0xff]  }
   0x3   :  { %v611_v2 = vld [vmem:[%s811_s1 + $0xf8] sm:$0xff]   ;;  %535 = vmatpush3.bf16.msra.mxu0 %v610_v1  ;;  %v615_v6 = vld [vmem:[%s811_s1 + $0xf0] sm:$0xff]   ;;  %v619_v10 = vld [vmem:[%s811_s1 + $0xe8] sm:$0xff]  }
   0x4   :  { %v612_v3 = vld [vmem:[%s811_s1 + $0xb8] sm:$0xff]   ;;  %556 = vmatprep.subr.bf16.mxu1 %v611_v2  ;;  %536 = vmatprep.subr.bf16.mxu0 %v613_v4  ;;  %v616_v7 = vld [vmem:[%s811_s1 + $0xb0] sm:$0xff]   ;;  %v620_v11 = vld [vmem:[%s811_s1 + $0xa8] sm:$0xff]  }
   0x5   :  { %557 = vmatpush3.bf16.msra.mxu1 %v612_v3  ;;  %v621_v12 = vld [vmem:[%s811_s1 + $0x60] sm:$0xff]   ;;  %v625_v16 = vld [vmem:[%s811_s1 + $0x58] sm:$0xff]   ;;  %v629_v20 = vld [vmem:[%s811_s1 + $0x50] sm:$0xff]  }
   0x6   :  { %558 = vmatprep.subr.bf16.mxu1 %v615_v6  ;;  %v622_v13 = vld [vmem:[%s811_s1 + $0x20] sm:$0xff]   ;;  %v626_v17 = vld [vmem:[%s811_s1 + $0x18] sm:$0xff]   ;;  %v630_v21 = vld [vmem:[%s811_s1 + $0x10] sm:$0xff]  }
   0x7   :  { %537 = vmatpush3.bf16.msra.mxu0 %v614_v5  ;;  %v623_v14 = vld [vmem:[%s811_s1 + $0xe0] sm:$0xff]   ;;  %v627_v18 = vld [vmem:[%s811_s1 + $0xd8] sm:$0xff]   ;;  %v631_v22 = vld [vmem:[%s811_s1 + $0xd0] sm:$0xff]  }
   0x8   :  { %538 = vmatprep.subr.bf16.mxu0 %v617_v8  ;;  %v624_v15 = vld [vmem:[%s811_s1 + $0xa0] sm:$0xff]   ;;  %v628_v19 = vld [vmem:[%s811_s1 + $0x98] sm:$0xff]   ;;  %v632_v23 = vld [vmem:[%s811_s1 + $0x90] sm:$0xff]  }
   0x9   :  { %559 = vmatpush3.bf16.msra.mxu1 %v616_v7  ;;  %v633_v24 = vld [vmem:[%s811_s1 + $0x48] sm:$0xff]   ;;  %v637_v28 = vld [vmem:[%s811_s1 + $0x40] sm:$0xff]   ;;  %v646_v39 = vld [vmem:[%s811_s1 + $0x138] sm:$0xff]  }
   0xa   :  { %560 = vmatprep.subr.bf16.mxu1 %v619_v10  ;;  %v634_v25 = vld [vmem:[%s811_s1 + $0x8] sm:$0xff]   ;;  %v638_v29 = vld [vmem:[%s811_s1] sm:$0xff]   ;;  %v647_v40 = vld [vmem:[%s811_s1 + $0x130] sm:$0xff]  }
   0xb   :  { %539 = vmatpush3.bf16.msra.mxu0 %v618_v9  ;;  %v635_v26 = vld [vmem:[%s811_s1 + $0xc8] sm:$0xff]   ;;  %v639_v30 = vld [vmem:[%s811_s1 + $0xc0] sm:$0xff]   ;;  %v650_v43 = vld [vmem:[%s811_s1 + $0x118] sm:$0xff]  }
   0xc   :  { %540 = vmatprep.subr.bf16.mxu0 %v621_v12  ;;  %v636_v27 = vld [vmem:[%s811_s1 + $0x88] sm:$0xff]   ;;  %v15_v31 = vld [vmem:[%s812_s0] sm:$0xff]  ;;  %v651_v44 = vld [vmem:[%s811_s1 + $0x110] sm:$0xff]  }
   0xd   :  { %561 = vmatpush3.bf16.msra.mxu1 %v620_v11  ;;  %v489_v32 = vcombine.low %v15_v31, %v15_v31  ;;  %v490_v33 = vcombine.high %v15_v31, %v15_v31  ;;  %v643_v34 = vld [vmem:[%s811_s1 + $0x80] sm:$0xff]   ;;  %v16_v36 = vld [vmem:[%s812_s0 + $0x8] sm:$0xff]  ;;  %v642_v47 = vld [vmem:[%s812_s0 + $0x10] ss:$0 sps:$4 sm:$0xff]  }
   0xe   :  { %562 = vmatprep.subr.bf16.mxu1 %v623_v14  ;;  %v491_v37 = vcombine.low %v16_v36, %v16_v36  ;;  %v492_v38 = vcombine.high %v16_v36, %v16_v36  ;;  %v648_v41 = vld [vmem:[%s811_s1 + $0x128] sm:$0xff]   ;;  %v649_v42 = vld [vmem:[%s811_s1 + $0x120] sm:$0xff]  }
   0xf   :  { %541 = vmatpush3.bf16.msra.mxu0 %v622_v13  ;;  %395 = vmatprep.mubr.bf16.mxu0 %v490_v33  ;;  %v652_v45 = vld [vmem:[%s811_s1 + $0x108] sm:$0xff]   ;;  %v653_v46 = vld [vmem:[%s811_s1 + $0x100] sm:$0xff]  }
  0x10   :  { %542 = vmatprep.subr.bf16.mxu0 %v625_v16  ;;  %435 = vmatprep.mubr.bf16.mxu1 %v492_v38  ;;  %v488_v57 = vld [vmem:[%s813_s2] ss:$0 sm:$0xff] }
  0x11   :  { %563 = vmatpush3.bf16.msra.mxu1 %v624_v15 }
  0x12   :  { %564 = vmatprep.subr.bf16.mxu1 %v627_v18 }
  0x13   :  { %543 = vmatpush3.bf16.msra.mxu0 %v626_v17 }
  0x14   :  { %544 = vmatprep.subr.bf16.mxu0 %v629_v20 }
  0x15   :  { %565 = vmatpush3.bf16.msra.mxu1 %v628_v19 }
  0x16   :  { %566 = vmatprep.subr.bf16.mxu1 %v631_v22 }
  0x17   :  { %545 = vmatpush3.bf16.msra.mxu0 %v630_v21 }
  0x18   :  { %546 = vmatprep.subr.bf16.mxu0 %v633_v24 }
  0x19   :  { %567 = vmatpush3.bf16.msra.mxu1 %v632_v23 }
  0x1a   :  { %568 = vmatprep.subr.bf16.mxu1 %v635_v26 }
  0x1b   :  { %547 = vmatpush3.bf16.msra.mxu0 %v634_v25 }
  0x1c   :  { %548 = vmatprep.subr.bf16.mxu0 %v637_v28 }
  0x1d   :  { %569 = vmatpush3.bf16.msra.mxu1 %v636_v27 }
  0x1e   :  { %570 = vmatprep.subr.bf16.mxu1 %v639_v30 }
  0x1f   :  { %549 = vmatpush3.bf16.msra.mxu0 %v638_v29 }
  0x20   :  { %587 = vmatprep.subr.bf16.mxu0 %v654_v35 }
  0x21   :  { %571 = vmatpush3.bf16.msra.mxu1 %v643_v34 }
  0x22   :  { %396 = vmatmul.mubr.bf16.vlgmr.msra.gmra.mxu0 %v489_v32 }
  0x23   :  { %588 = vmatpush3.bf16.msra.mxu0 %v646_v39  ;;  %603 = vmatprep.mubr.msk.bf16.mxu0 %vm655_vm0, %v654_v35 }
  0x24   :  { %436 = vmatmul.mubr.bf16.vlgmr.msra.gmra.mxu1 %v491_v37  ;;  %589 = vmatprep.subr.bf16.mxu0 %v654_v35 }
  0x27   :  { %590 = vmatpush3.bf16.msra.mxu0 %v647_v40 }
  0x28   :  { %591 = vmatprep.subr.bf16.mxu0 %v654_v35 }
  0x2b   :  { %592 = vmatpush3.bf16.msra.mxu0 %v648_v41 }
  0x2c   :  { %593 = vmatprep.subr.bf16.mxu0 %v654_v35 }
  0x2f   :  { %594 = vmatpush3.bf16.msra.mxu0 %v649_v42 }
  0x30   :  { %595 = vmatprep.subr.bf16.mxu0 %v654_v35 }
  0x33   :  { %596 = vmatpush3.bf16.msra.mxu0 %v650_v43 }
  0x34   :  { %597 = vmatprep.subr.bf16.mxu0 %v654_v35 }
  0x37   :  { %598 = vmatpush3.bf16.msra.mxu0 %v651_v44 }
  0x38   :  { %599 = vmatprep.subr.bf16.mxu0 %v654_v35 }
  0x3b   :  { %600 = vmatpush3.bf16.msra.mxu0 %v652_v45 }
  0x3c   :  { %601 = vmatprep.subr.bf16.mxu0 %v654_v35 }
  0x3f   :  { %602 = vmatpush3.bf16.msra.mxu0 %v653_v46 }
  0x42   :  { %604 = vmatmul.mubr.bf16.vlgmr.msra.gmra.mxu0 %v642_v47 }
  0xe2   :  { %v550_v48 = vpop.f32.mrf.mxu0 }
  0xe4   :  { %v551_v49 = vpop.f32.mrf.mxu0  ;;  %v572_v50 = vpop.f32.mrf.mxu1 }
  0xe5   :  { %v552_v56 = vadd.f32 %v551_v49, %v550_v48 }
  0xe6   :  { %v553_v51 = vpop.f32.mrf.mxu0  ;;  %v573_v52 = vpop.f32.mrf.mxu1 }
  0xe7   :  { %v398_v58 = vadd.f32 %v552_v56, %v488_v57  ;;  %v574_v59 = vadd.f32 %v573_v52, %v572_v50 }
  0xe8   :  { %v554_v53 = vpop.f32.mrf.mxu0  ;;  %v575_v54 = vpop.f32.mrf.mxu1 }
  0xe9   :  { %v438_v60 = vadd.f32 %v574_v59, %v398_v58 }
  0xea   :  { %v576_v55 = vpop.f32.mrf.mxu1 }
 0x102   :  { %v477_v61 = vpop.f32.mrf.mxu0 }
 0x103   :  { %v478_v62 = vadd.f32 %v477_v61, %v438_v60 }
 0x104   :  { %v605_v63 = vpop.f32.mrf.mxu0 }
 0x105   :  { %483 = vst [vmem:[%s814_s3] sm:$0xff] %v478_v62 }
 0x106   :  { %v480_v0 = vpop.f32.mrf.mxu0 }
 0x108   :  { %v606_v1 = vpop.f32.mrf.mxu0 }

</bundles_post_ra>
